<compile_context>
chip_gen: v5e
topology: v5e:2x2
jax: 0.10.0
libtpu: 0.0.40
codegen_flags: <defaults>
</compile_context>

<pallas_src>
import jax
import jax.numpy as jnp
from jax.experimental import pallas as pl
from jax.experimental.pallas import tpu as pltpu

EPS = 1e-5
LANES = 128


def _residual_block_kernel(xp_ref, w1_ref, g1_ref, be1_ref,
                           w2_ref, g2_ref, be2_ref, p_ref, o_ref):
    # xp_ref : (NG, H+2, L) f32  packed input, H zero-padded by 1 row top/bottom
    #          lane l = packed_image*(W*C) + w*C + c ; W padding folded into wX
    # wX_ref : (3*L, L)  bf16    band-structured conv slab, row = dy*L + l_in
    # gX/beX : (1, L)    f32     BN gamma / beta broadcast to the packed lanes
    # p_ref  : (L, L)    f32     channel aggregation: P[l,l'] = [l%C==l'%C]/cnt
    # o_ref  : (NG, H, L) f32
    NG, Hp, L = xp_ref.shape
    H = Hp - 2
    M = NG * H

    def conv3x3(a_pad, w_ref):
        # a_pad: (NG, H+2, L) f32.  One bf16 MXU matmul with K = 3*L; the
        # dx shifts / W padding are encoded in the weight slab's band blocks.
        cols = jnp.concatenate([a_pad[:, dy:dy + H, :] for dy in range(3)],
                               axis=-1).reshape(M, 3 * L)
        return jnp.dot(cols.astype(jnp.bfloat16), w_ref[...],
                       preferred_element_type=jnp.float32)          # (M, L) f32

    def bn_relu(y, g_row, b_row, relu):
        # Training-mode BatchNorm2d in one sweep: per-channel sum & sumsq,
        # aggregated + lane-broadcast by one tiny matmul, then a fused affine.
        stats = jnp.concatenate(
            [jnp.sum(y, axis=0, keepdims=True),
             jnp.sum(y * y, axis=0, keepdims=True)], axis=0)        # (2, L)
        stats = jnp.dot(stats, p_ref[...],
                        preferred_element_type=jnp.float32)         # (2, L)
        mean, ex2 = stats[0:1, :], stats[1:2, :]
        var = jnp.maximum(ex2 - mean * mean, 0.0)    # clamp one-pass variance
        scale = g_row * jax.lax.rsqrt(var + EPS)
        shift = b_row - mean * scale
        out = y * scale + shift
        return jnp.maximum(out, 0.0) if relu else out

    xp = xp_ref[...]

    # ---- conv1 -> bn1 -> relu (one matmul + one fused affine pass) ----------
    out1 = bn_relu(conv3x3(xp, w1_ref), g1_ref[...], be1_ref[...], relu=True)

    # Residual identity = original (un-shifted) input rows, kept in f32.
    identity = xp[:, 1:H + 1, :].reshape(M, L)

    # Re-pad conv1's output along H only (W padding lives in the weight slab):
    # no scratch buffer, no masked halo stores.
    zrow = jnp.zeros((NG, 1, L), jnp.float32)
    out1_pad = jnp.concatenate([zrow, out1.reshape(NG, H, L), zrow], axis=1)

    # ---- conv2 -> bn2 -> +identity -> relu -----------------------------------
    out2 = bn_relu(conv3x3(out1_pad, w2_ref), g2_ref[...], be2_ref[...],
                   relu=False)
    o_ref[...] = jnp.maximum(out2 + identity, 0.0).reshape(NG, H, L)


def residual_block(x_nchw, params):
    """Forward pass of ResidualBlock. x_nchw: (N, C, H, W) float32."""
    N, C, H, W = x_nchw.shape

    # Space-to-depth packing: put (image, w, c) on the lane axis.
    # TODO(synk): if W*C > 128, tile W across lane groups (needs a W halo).
    assert W * C <= LANES, "W*C > 128 needs W tiling"
    gn = max(1, min(N, LANES // (W * C)))   # images packed into the lane axis
    while N % gn:
        gn -= 1
    NG = N // gn                            # remaining image groups (leading dim)
    L = gn * W * C                          # packed lane count (128 at test shape)
    cnt = N * H * W                         # BN reduction count per channel

    # NCHW -> packed (NG, H, L), zero-pad H by 1 row (plain JAX layout glue).
    x = jnp.transpose(x_nchw, (0, 2, 3, 1)).astype(jnp.float32)        # (N,H,W,C)
    x = x.reshape(NG, gn, H, W, C).transpose(0, 2, 1, 3, 4).reshape(NG, H, L)
    xp = jnp.pad(x, ((0, 0), (1, 1), (0, 0)))

    # Band-structured conv slab (bf16): for each dy, a block-tridiagonal (L, L)
    # matrix over the W groups.  Input group w' feeds output group
    # w = w' - (dx - 1); boundary blocks are simply absent => 'SAME' zero pad.
    eye_gn = jnp.eye(gn, dtype=jnp.float32)

    def prep_w(w_oihw):
        w = w_oihw.astype(jnp.float32)
        bands = []
        for dy in range(3):
            b = jnp.zeros((L, L), jnp.float32)
            for dx in range(3):
                adj = jnp.kron(eye_gn, jnp.eye(W, k=1 - dx, dtype=jnp.float32))
                kmat = w[:, :, dy, dx].T                           # (Cin, Cout)
                b = b + jnp.kron(adj, kmat)
            bands.append(b)
        return jnp.concatenate(bands, axis=0).astype(jnp.bfloat16)    # (3L, L)

    def prep_v(v):
        # (C,) -> (1, L): per-channel value broadcast to every packed lane.
        # Every lane is real data now (no padded-gamma blow-up hazard).
        return jnp.tile(v.astype(jnp.float32), gn * W).reshape(1, L)

    # Channel-aggregation matrix: P[l, l'] = 1/cnt if lanes l and l' carry the
    # same channel; (sum-over-sublanes row) @ P == per-channel mean broadcast
    # back to every lane.
    chan = jnp.arange(L, dtype=jnp.int32) % C
    pmat = (chan[:, None] == chan[None, :]).astype(jnp.float32) / float(cnt)

    # Conv biases b1/b2 are intentionally NOT passed: training-mode BN subtracts
    # the batch mean right after each conv, which cancels a per-channel bias.
    args = (xp,
            prep_w(params["w1"]), prep_v(params["g1"]), prep_v(params["be1"]),
            prep_w(params["w2"]), prep_v(params["g2"]), prep_v(params["be2"]),
            pmat)

    # VMEM limit from the actual footprint (+ headroom), capped at 48 MiB so
    # the same setting leaves double-buffer headroom under v7x's 64 MiB VMEM.
    arg_bytes = sum(a.size * a.dtype.itemsize for a in args) + NG * H * L * 4
    vmem_limit = int(min(max(4 * arg_bytes, 16 << 20), 48 << 20))

    vmem = pl.BlockSpec(memory_space=pltpu.MemorySpace.VMEM)
    out = pl.pallas_call(
        _residual_block_kernel,
        out_shape=jax.ShapeDtypeStruct((NG, H, L), jnp.float32),
        in_specs=[vmem] * len(args),
        out_specs=vmem,
        compiler_params=pltpu.CompilerParams(vmem_limit_bytes=vmem_limit),
    )(*args)

    # Unpack (NG, H, L) -> (N, C, H, W).
    out = out.reshape(NG, H, gn, W, C).transpose(0, 2, 4, 1, 3).reshape(N, C, H, W)
    return out.astype(x_nchw.dtype)


def residual_block_ref(x, params):
    """Pure-JAX reference (same semantics, biases included) for verification."""
    def conv(x, w, b):
        y = jax.lax.conv_general_dilated(
            x, w, window_strides=(1, 1), padding="SAME",
            dimension_numbers=("NCHW", "OIHW", "NCHW"))
        return y + b.reshape(1, -1, 1, 1)

    def bn(y, g, b):
        mean = jnp.mean(y, axis=(0, 2, 3), keepdims=True)
        var = jnp.mean((y - mean) ** 2, axis=(0, 2, 3), keepdims=True)
        return (y - mean) * jax.lax.rsqrt(var + EPS) * g.reshape(1, -1, 1, 1) \
            + b.reshape(1, -1, 1, 1)

    out = jax.nn.relu(bn(conv(x, params["w1"], params["b1"]),
                         params["g1"], params["be1"]))
    out = bn(conv(out, params["w2"], params["b2"]),
             params["g2"], params["be2"])
    return jax.nn.relu(out + x)


def init_params(key, channels):
    k1, k2, k3, k4 = jax.random.split(key, 4)
    scale = 0.1
    return {
        "w1": scale * jax.random.normal(k1, (channels, channels, 3, 3), jnp.float32),
        "b1": scale * jax.random.normal(k2, (channels,), jnp.float32),
        "g1": jnp.ones((channels,), jnp.float32),
        "be1": jnp.zeros((channels,), jnp.float32),
        "w2": scale * jax.random.normal(k3, (channels, channels, 3, 3), jnp.float32),
        "b2": scale * jax.random.normal(k4, (channels,), jnp.float32),
        "g2": jnp.ones((channels,), jnp.float32),
        "be2": jnp.zeros((channels,), jnp.float32),
    }


if __name__ == "__main__":
    key = jax.random.PRNGKey(0)
    kx, kp = jax.random.split(key)

    N, C, H, W = 2, 4, 16, 16
    x = jax.random.normal(kx, (N, C, H, W), jnp.float32)
    params = init_params(kp, C)

    out = jax.block_until_ready(jax.jit(residual_block)(x, params))
    ref = jax.block_until_ready(jax.jit(residual_block_ref)(x, params))

    assert out.shape == (N, C, H, W)
    err = jnp.max(jnp.abs(out - ref))
    # Tolerance loosened vs. 1e-3: MXU operands are bf16 (f32 accumulation)
    # through two convs and two BN normalizations.
    assert jnp.allclose(out, ref, atol=5e-2, rtol=5e-2), f"max abs err = {err}"
    print("KERNEL_OK")
</pallas_src>

<mosaic_0001>
module attributes {stable_mosaic.version = 11 : i64} {
  func.func @_residual_block_kernel(%arg0: memref<1x18x128xf32, #tpu.memory_space<vmem>>, %arg1: memref<384x128xbf16, #tpu.memory_space<vmem>>, %arg2: memref<1x128xf32, #tpu.memory_space<vmem>>, %arg3: memref<1x128xf32, #tpu.memory_space<vmem>>, %arg4: memref<384x128xbf16, #tpu.memory_space<vmem>>, %arg5: memref<1x128xf32, #tpu.memory_space<vmem>>, %arg6: memref<1x128xf32, #tpu.memory_space<vmem>>, %arg7: memref<128x128xf32, #tpu.memory_space<vmem>>, %arg8: memref<1x16x128xf32, #tpu.memory_space<vmem>>) attributes {dimension_semantics = [], scalar_prefetch = 0 : i64, scratch_operands = 0 : i64, tpu.core_type = #tpu.core_type<tc>} {
    %c0 = arith.constant 0 : index
    %c0_0 = arith.constant 0 : index
    %c0_1 = arith.constant 0 : index
    %0 = vector.load %arg0[%c0, %c0_0, %c0_1] : memref<1x18x128xf32, #tpu.memory_space<vmem>>, vector<1x18x128xf32>
    %1 = vector.extract_strided_slice %0 {offsets = [0, 0, 0], sizes = [1, 16, 128], strides = [1, 1, 1]} : vector<1x18x128xf32> to vector<1x16x128xf32>
    %2 = vector.extract_strided_slice %0 {offsets = [0, 1, 0], sizes = [1, 16, 128], strides = [1, 1, 1]} : vector<1x18x128xf32> to vector<1x16x128xf32>
    %3 = vector.extract_strided_slice %0 {offsets = [0, 2, 0], sizes = [1, 16, 128], strides = [1, 1, 1]} : vector<1x18x128xf32> to vector<1x16x128xf32>
    %4 = tpu.concatenate %1, %2, %3 in 2 : vector<1x16x128xf32>, vector<1x16x128xf32>, vector<1x16x128xf32> -> vector<1x16x384xf32>
    %5 = vector.shape_cast %4 : vector<1x16x384xf32> to vector<16x384xf32>
    %6 = arith.truncf %5 : vector<16x384xf32> to vector<16x384xbf16>
    %c0_2 = arith.constant 0 : index
    %c0_3 = arith.constant 0 : index
    %7 = vector.load %arg1[%c0_2, %c0_3] : memref<384x128xbf16, #tpu.memory_space<vmem>>, vector<384x128xbf16>
    %cst = arith.constant dense<0.000000e+00> : vector<16x128xf32>
    %8 = tpu.matmul %6, %7, %cst {dimension_numbers = #tpu.dot_dimension_numbers<[1], [0], [0], [1], [0, 0, 1, 1], [], []>} : vector<16x384xbf16>, vector<384x128xbf16>, vector<16x128xf32> -> vector<16x128xf32>
    %c0_4 = arith.constant 0 : index
    %c0_5 = arith.constant 0 : index
    %9 = vector.load %arg2[%c0_4, %c0_5] : memref<1x128xf32, #tpu.memory_space<vmem>>, vector<1x128xf32>
    %c0_6 = arith.constant 0 : index
    %c0_7 = arith.constant 0 : index
    %10 = vector.load %arg3[%c0_6, %c0_7] : memref<1x128xf32, #tpu.memory_space<vmem>>, vector<1x128xf32>
    %cst_8 = arith.constant dense<0.000000e+00> : vector<128xf32>
    %11 = vector.multi_reduction <add>, %8, %cst_8 [0] : vector<16x128xf32> to vector<128xf32>
    %12 = vector.shape_cast %11 : vector<128xf32> to vector<1x128xf32>
    %13 = arith.mulf %8, %8 : vector<16x128xf32>
    %cst_9 = arith.constant dense<0.000000e+00> : vector<128xf32>
    %14 = vector.multi_reduction <add>, %13, %cst_9 [0] : vector<16x128xf32> to vector<128xf32>
    %15 = vector.shape_cast %14 : vector<128xf32> to vector<1x128xf32>
    %16 = tpu.concatenate %12, %15 in 0 : vector<1x128xf32>, vector<1x128xf32> -> vector<2x128xf32>
    %c0_10 = arith.constant 0 : index
    %c0_11 = arith.constant 0 : index
    %17 = vector.load %arg7[%c0_10, %c0_11] : memref<128x128xf32, #tpu.memory_space<vmem>>, vector<128x128xf32>
    %cst_12 = arith.constant dense<0.000000e+00> : vector<2x128xf32>
    %18 = tpu.matmul %16, %17, %cst_12 {dimension_numbers = #tpu.dot_dimension_numbers<[1], [0], [0], [1], [0, 0, 1, 1], [], []>} : vector<2x128xf32>, vector<128x128xf32>, vector<2x128xf32> -> vector<2x128xf32>
    %19 = vector.extract_strided_slice %18 {offsets = [0, 0], sizes = [1, 128], strides = [1, 1]} : vector<2x128xf32> to vector<1x128xf32>
    %20 = vector.extract_strided_slice %18 {offsets = [1, 0], sizes = [1, 128], strides = [1, 1]} : vector<2x128xf32> to vector<1x128xf32>
    %21 = arith.mulf %19, %19 : vector<1x128xf32>
    %22 = arith.subf %20, %21 : vector<1x128xf32>
    %cst_13 = arith.constant 0.000000e+00 : f32
    %23 = vector.broadcast %cst_13 : f32 to vector<1x128xf32>
    %24 = arith.maximumf %22, %23 : vector<1x128xf32>
    %cst_14 = arith.constant 9.99999974E-6 : f32
    %25 = vector.broadcast %cst_14 : f32 to vector<1x128xf32>
    %26 = arith.addf %24, %25 : vector<1x128xf32>
    %27 = math.rsqrt %26 : vector<1x128xf32>
    %28 = arith.mulf %9, %27 : vector<1x128xf32>
    %29 = arith.mulf %19, %28 : vector<1x128xf32>
    %30 = arith.subf %10, %29 : vector<1x128xf32>
    %31 = vector.broadcast %28 : vector<1x128xf32> to vector<16x128xf32>
    %32 = arith.mulf %8, %31 : vector<16x128xf32>
    %33 = vector.broadcast %30 : vector<1x128xf32> to vector<16x128xf32>
    %34 = arith.addf %32, %33 : vector<16x128xf32>
    %cst_15 = arith.constant 0.000000e+00 : f32
    %35 = vector.broadcast %cst_15 : f32 to vector<16x128xf32>
    %36 = arith.maximumf %34, %35 : vector<16x128xf32>
    %37 = vector.extract_strided_slice %0 {offsets = [0, 1, 0], sizes = [1, 16, 128], strides = [1, 1, 1]} : vector<1x18x128xf32> to vector<1x16x128xf32>
    %38 = vector.shape_cast %37 : vector<1x16x128xf32> to vector<16x128xf32>
    %cst_16 = arith.constant 0.000000e+00 : f32
    %39 = vector.broadcast %cst_16 : f32 to vector<1x1x128xf32>
    %40 = vector.shape_cast %36 : vector<16x128xf32> to vector<1x16x128xf32>
    %41 = tpu.concatenate %39, %40, %39 in 1 : vector<1x1x128xf32>, vector<1x16x128xf32>, vector<1x1x128xf32> -> vector<1x18x128xf32>
    %42 = vector.extract_strided_slice %41 {offsets = [0, 0, 0], sizes = [1, 16, 128], strides = [1, 1, 1]} : vector<1x18x128xf32> to vector<1x16x128xf32>
    %43 = vector.extract_strided_slice %41 {offsets = [0, 1, 0], sizes = [1, 16, 128], strides = [1, 1, 1]} : vector<1x18x128xf32> to vector<1x16x128xf32>
    %44 = vector.extract_strided_slice %41 {offsets = [0, 2, 0], sizes = [1, 16, 128], strides = [1, 1, 1]} : vector<1x18x128xf32> to vector<1x16x128xf32>
    %45 = tpu.concatenate %42, %43, %44 in 2 : vector<1x16x128xf32>, vector<1x16x128xf32>, vector<1x16x128xf32> -> vector<1x16x384xf32>
    %46 = vector.shape_cast %45 : vector<1x16x384xf32> to vector<16x384xf32>
    %47 = arith.truncf %46 : vector<16x384xf32> to vector<16x384xbf16>
    %c0_17 = arith.constant 0 : index
    %c0_18 = arith.constant 0 : index
    %48 = vector.load %arg4[%c0_17, %c0_18] : memref<384x128xbf16, #tpu.memory_space<vmem>>, vector<384x128xbf16>
    %cst_19 = arith.constant dense<0.000000e+00> : vector<16x128xf32>
    %49 = tpu.matmul %47, %48, %cst_19 {dimension_numbers = #tpu.dot_dimension_numbers<[1], [0], [0], [1], [0, 0, 1, 1], [], []>} : vector<16x384xbf16>, vector<384x128xbf16>, vector<16x128xf32> -> vector<16x128xf32>
    %c0_20 = arith.constant 0 : index
    %c0_21 = arith.constant 0 : index
    %50 = vector.load %arg5[%c0_20, %c0_21] : memref<1x128xf32, #tpu.memory_space<vmem>>, vector<1x128xf32>
    %c0_22 = arith.constant 0 : index
    %c0_23 = arith.constant 0 : index
    %51 = vector.load %arg6[%c0_22, %c0_23] : memref<1x128xf32, #tpu.memory_space<vmem>>, vector<1x128xf32>
    %cst_24 = arith.constant dense<0.000000e+00> : vector<128xf32>
    %52 = vector.multi_reduction <add>, %49, %cst_24 [0] : vector<16x128xf32> to vector<128xf32>
    %53 = vector.shape_cast %52 : vector<128xf32> to vector<1x128xf32>
    %54 = arith.mulf %49, %49 : vector<16x128xf32>
    %cst_25 = arith.constant dense<0.000000e+00> : vector<128xf32>
    %55 = vector.multi_reduction <add>, %54, %cst_25 [0] : vector<16x128xf32> to vector<128xf32>
    %56 = vector.shape_cast %55 : vector<128xf32> to vector<1x128xf32>
    %57 = tpu.concatenate %53, %56 in 0 : vector<1x128xf32>, vector<1x128xf32> -> vector<2x128xf32>
    %c0_26 = arith.constant 0 : index
    %c0_27 = arith.constant 0 : index
    %58 = vector.load %arg7[%c0_26, %c0_27] : memref<128x128xf32, #tpu.memory_space<vmem>>, vector<128x128xf32>
    %cst_28 = arith.constant dense<0.000000e+00> : vector<2x128xf32>
    %59 = tpu.matmul %57, %58, %cst_28 {dimension_numbers = #tpu.dot_dimension_numbers<[1], [0], [0], [1], [0, 0, 1, 1], [], []>} : vector<2x128xf32>, vector<128x128xf32>, vector<2x128xf32> -> vector<2x128xf32>
    %60 = vector.extract_strided_slice %59 {offsets = [0, 0], sizes = [1, 128], strides = [1, 1]} : vector<2x128xf32> to vector<1x128xf32>
    %61 = vector.extract_strided_slice %59 {offsets = [1, 0], sizes = [1, 128], strides = [1, 1]} : vector<2x128xf32> to vector<1x128xf32>
    %62 = arith.mulf %60, %60 : vector<1x128xf32>
    %63 = arith.subf %61, %62 : vector<1x128xf32>
    %cst_29 = arith.constant 0.000000e+00 : f32
    %64 = vector.broadcast %cst_29 : f32 to vector<1x128xf32>
    %65 = arith.maximumf %63, %64 : vector<1x128xf32>
    %cst_30 = arith.constant 9.99999974E-6 : f32
    %66 = vector.broadcast %cst_30 : f32 to vector<1x128xf32>
    %67 = arith.addf %65, %66 : vector<1x128xf32>
    %68 = math.rsqrt %67 : vector<1x128xf32>
    %69 = arith.mulf %50, %68 : vector<1x128xf32>
    %70 = arith.mulf %60, %69 : vector<1x128xf32>
    %71 = arith.subf %51, %70 : vector<1x128xf32>
    %72 = vector.broadcast %69 : vector<1x128xf32> to vector<16x128xf32>
    %73 = arith.mulf %49, %72 : vector<16x128xf32>
    %74 = vector.broadcast %71 : vector<1x128xf32> to vector<16x128xf32>
    %75 = arith.addf %73, %74 : vector<16x128xf32>
    %76 = arith.addf %75, %38 : vector<16x128xf32>
    %cst_31 = arith.constant 0.000000e+00 : f32
    %77 = vector.broadcast %cst_31 : f32 to vector<16x128xf32>
    %78 = arith.maximumf %76, %77 : vector<16x128xf32>
    %79 = vector.shape_cast %78 : vector<16x128xf32> to vector<1x16x128xf32>
    %c0_32 = arith.constant 0 : index
    %c0_33 = arith.constant 0 : index
    %c0_34 = arith.constant 0 : index
    %80 = vector.load %arg8[%c0_32, %c0_33, %c0_34] : memref<1x16x128xf32, #tpu.memory_space<vmem>>, vector<1x16x128xf32>
    tpu.vector_store %arg8[%c0_32, %c0_33, %c0_34], %79 {strides = array<i32>} : memref<1x16x128xf32, #tpu.memory_space<vmem>>, vector<1x16x128xf32>,
    return
  }
}

</mosaic_0001>

<bundles_post_ra>
// kernel: tile.23
= control target key start
LH: loop header
LB: loop body
LE: loop exit
PB: predicated region body
PF: predicated region fallthrough
CT: control target
= control target key end

     0   :  { %s40_s0 = inlined_call_operand.vmem [shape: f32[4], index: 0, kind: input, shape index: {}]   ;;  %s41_s1 = inlined_call_operand.vmem [shape: f32[32,4], index: 1, kind: output, shape index: {}]  }
   0x1   :  { %v4_v0 = vld [vmem:[%s40_s0] ss:$0 sm:$0xff] }
   0x2   :  { %5 = vst [vmem:[%s41_s1] sm:$0xff] %v4_v0 }
   0x3   :  { %12 = vst [vmem:[%s41_s1 + $0x8] sm:$0xff] %v4_v0 }
   0x4   :  { %13 = vst [vmem:[%s41_s1 + $0x10] sm:$0xff] %v4_v0 }
   0x5   :  { %14 = vst [vmem:[%s41_s1 + $0x18] sm:$0xff] %v4_v0 }

// kernel: tile.24
= control target key start
LH: loop header
LB: loop body
LE: loop exit
PB: predicated region body
PF: predicated region fallthrough
CT: control target
= control target key end

     0   :  { %s259_s10 = smov 124   ;;  %s260_s11 = smov 116   ;;  %vm3_vm0 = vcmask 31744   ;;  %vm9_vm1 = vcmask 1048544   ;;  %vm15_vm2 = vcmask 1015744   ;;  %vm21_vm3 = vcmask 982944   ;;  %s399_s0 = inlined_call_operand.vmem [shape: f32[32,4], index: 0, kind: input, shape index: {}]   ;;  %s400_s1 = inlined_call_operand.vmem [shape: f32[1,128], index: 1, kind: output, shape index: {}]  }
   0x1   :  { %v197_v0 = vld [vmem:[%s399_s0 + $0x1f] sm:$0x1]   ;;  %v199_v1 = vld [vmem:[%s399_s0 + $0x1d] sm:$0x1]   ;;  %v201_v2 = vld [vmem:[%s399_s0 + $0x1b] sm:$0x1]  }
   0x2   :  { %7 = vrot.lane.b32.xlu0 %v197_v0, %s259_s10  ;;  %19 = vrot.lane.b32.xlu1 %v199_v1, %s260_s11  ;;  %s261_s14 = smov 108   ;;  %v198_v3 = vld [vmem:[%s399_s0 + $0x1e] sm:$0x1]   ;;  %v200_v4 = vld [vmem:[%s399_s0 + $0x1c] sm:$0x1]   ;;  %s262_s19 = smov 120  }
   0x3   :  { %31 = vrot.lane.b32.xlu2 %v201_v2, %s261_s14  ;;  %s263_s20 = smov 112   ;;  %v202_v5 = vld [vmem:[%s399_s0 + $0x1a] sm:$0x1]   ;;  %s264_s23 = smov 104   ;;  %v203_v6 = vld [vmem:[%s399_s0 + $0x19] sm:$0x1]  }
   0x4   :  { %v204_v7 = vld [vmem:[%s399_s0 + $0x18] sm:$0x1]   ;;  %s265_s28 = smov 100   ;;  %s266_s29 = smov 96   ;;  %v205_v8 = vld [vmem:[%s399_s0 + $0x17] sm:$0x1]  }
   0x5   :  { %s267_s3 = smov 92   ;;  %v206_v9 = vld [vmem:[%s399_s0 + $0x16] sm:$0x1]   ;;  %v207_v10 = vld [vmem:[%s399_s0 + $0x15] sm:$0x1]   ;;  %s268_s8 = smov 88  }
   0x6   :  { %s269_s9 = smov 84   ;;  %v208_v11 = vld [vmem:[%s399_s0 + $0x14] sm:$0x1]   ;;  %s270_s12 = smov 80   ;;  %v209_v12 = vld [vmem:[%s399_s0 + $0x13] sm:$0x1]  }
   0x7   :  { %v210_v13 = vld [vmem:[%s399_s0 + $0x12] sm:$0x1]   ;;  %s271_s17 = smov 76   ;;  %s272_s18 = smov 72   ;;  %v211_v14 = vld [vmem:[%s399_s0 + $0x11] sm:$0x1]  }
   0x8   :  { %s273_s21 = smov 68   ;;  %v212_v15 = vld [vmem:[%s399_s0 + $0x10] sm:$0x1]   ;;  %v213_v16 = vld [vmem:[%s399_s0 + $0xf] sm:$0x1]   ;;  %s274_s26 = smov 64  }
   0x9   :  { %s275_s27 = smov 60   ;;  %v214_v17 = vld [vmem:[%s399_s0 + $0xe] sm:$0x1]   ;;  %s276_s30 = smov 56   ;;  %v215_v18 = vld [vmem:[%s399_s0 + $0xd] sm:$0x1]  }
   0xa   :  { %13 = vrot.lane.b32.xlu0 %v198_v3, %s262_s19  ;;  %25 = vrot.lane.b32.xlu1 %v200_v4, %s263_s20  ;;  %v216_v19 = vld [vmem:[%s399_s0 + $0xc] sm:$0x1]   ;;  %s277_s6 = smov 52   ;;  %s278_s7 = smov 48   ;;  %v217_v20 = vld [vmem:[%s399_s0 + $0xb] sm:$0x1]  }
   0xb   :  { %37 = vrot.lane.b32.xlu2 %v202_v5, %s264_s23  ;;  %s279_s10 = smov 44   ;;  %v218_v21 = vld [vmem:[%s399_s0 + $0xa] sm:$0x1]   ;;  %v219_v22 = vld [vmem:[%s399_s0 + $0x9] sm:$0x1]   ;;  %s280_s15 = smov 40  }
   0xc   :  { %s281_s16 = smov 36   ;;  %v220_v23 = vld [vmem:[%s399_s0 + $0x8] sm:$0x1]   ;;  %s282_s19 = smov 32   ;;  %v221_v24 = vld [vmem:[%s399_s0 + $0x7] sm:$0x1]  }
   0xd   :  { %v222_v25 = vld [vmem:[%s399_s0 + $0x6] sm:$0x1]   ;;  %s283_s24 = smov 28   ;;  %s284_s25 = smov 24   ;;  %v223_v26 = vld [vmem:[%s399_s0 + $0x5] sm:$0x1]  }
   0xe   :  { %v224_v27 = vld [vmem:[%s399_s0 + $0x4] sm:$0x1]   ;;  %v225_v28 = vld [vmem:[%s399_s0 + $0x3] sm:$0x1]   ;;  %s286_s4 = smov 16   ;;  %s287_s5 = smov 12  }
   0xf   :  { %v226_v29 = vld [vmem:[%s399_s0 + $0x2] sm:$0x1]   ;;  %v227_v30 = vld [vmem:[%s399_s0 + $0x1] sm:$0x1]   ;;  %s289_s11 = smov 4   ;;  %vm27_vm4 = vcmask 950144  }
  0x10   :  { %v2_v31 = vld [vmem:[%s399_s0] sm:$0x1]   ;;  %vm33_vm5 = vcmask 917344   ;;  %vm39_vm6 = vcmask 884544   ;;  %vm45_vm7 = vcmask 851744   ;;  %vm51_vm8 = vcmask 818944  }
  0x11   :  { %4 = vst.msk [vmem:[#allocation0] sm:$0x1] %vm3_vm0, %v2_v31   ;;  %vm57_vm9 = vcmask 786144   ;;  %vm63_vm10 = vcmask 753344   ;;  %vm69_vm11 = vcmask 720544   ;;  %vm75_vm12 = vcmask 687744  }
  0x12   :  { %43 = vrot.lane.b32.xlu0 %v203_v6, %s265_s28  ;;  %49 = vrot.lane.b32.xlu1 %v204_v7, %s266_s29  ;;  %s285_s28 = smov 20   ;;  %vm81_vm13 = vcmask 654944   ;;  %vm87_vm14 = vcmask 622144   ;;  %vm93_vm15 = vcmask 589344   ;;  %vm99_vm0 = vcmask 556544  }
  0x13   :  { %55 = vrot.lane.b32.xlu2 %v205_v8, %s267_s3 }
  0x1a   :  { %61 = vrot.lane.b32.xlu0 %v206_v9, %s268_s8  ;;  %67 = vrot.lane.b32.xlu1 %v207_v10, %s269_s9  ;;  %s288_s8 = smov 8  }
  0x1b   :  { %73 = vrot.lane.b32.xlu2 %v208_v11, %s270_s12 }
  0x22   :  { %79 = vrot.lane.b32.xlu0 %v209_v12, %s271_s17  ;;  %85 = vrot.lane.b32.xlu1 %v210_v13, %s272_s18 }
  0x23   :  { %91 = vrot.lane.b32.xlu2 %v211_v14, %s273_s21 }
  0x2a   :  { %97 = vrot.lane.b32.xlu0 %v212_v15, %s274_s26  ;;  %103 = vrot.lane.b32.xlu1 %v213_v16, %s275_s27 }
  0x2b   :  { %109 = vrot.lane.b32.xlu2 %v214_v17, %s276_s30 }
  0x32   :  { %115 = vrot.lane.b32.xlu0 %v215_v18, %s277_s6  ;;  %121 = vrot.lane.b32.xlu1 %v216_v19, %s278_s7 }
  0x33   :  { %127 = vrot.lane.b32.xlu2 %v217_v20, %s279_s10 }
  0x3a   :  { %133 = vrot.lane.b32.xlu0 %v218_v21, %s280_s15  ;;  %139 = vrot.lane.b32.xlu1 %v219_v22, %s281_s16 }
  0x3b   :  { %145 = vrot.lane.b32.xlu2 %v220_v23, %s282_s19 }
  0x42   :  { %151 = vrot.lane.b32.xlu0 %v221_v24, %s283_s24  ;;  %157 = vrot.lane.b32.xlu1 %v222_v25, %s284_s25 }
  0x43   :  { %163 = vrot.lane.b32.xlu2 %v223_v26, %s285_s28 }
  0x4a   :  { %169 = vrot.lane.b32.xlu0 %v224_v27, %s286_s4  ;;  %175 = vrot.lane.b32.xlu1 %v225_v28, %s287_s5 }
  0x4b   :  { %181 = vrot.lane.b32.xlu2 %v226_v29, %s288_s8 }
  0x52   :  { %187 = vrot.lane.b32.xlu0 %v227_v30, %s289_s11 }
  0x5d   :  { %v32_v32 = vpop.permute.xlu2 %31  }
  0x65   :  { %v38_v33 = vpop.permute.xlu2 %37  }
  0x6d   :  { %v56_v34 = vpop.permute.xlu2 %55  }
  0x74   :  { %v8_v35 = vpop.permute.xlu0 %7   ;;  %v20_v36 = vpop.permute.xlu1 %19  }
  0x75   :  { %10 = vst.msk [vmem:[#allocation0] sm:$0x1] %vm9_vm1, %v8_v35   ;;  %v74_v37 = vpop.permute.xlu2 %73   ;;  %vm105_vm1 = vcmask 523744  }
  0x7c   :  { %v14_v38 = vpop.permute.xlu0 %13   ;;  %v26_v39 = vpop.permute.xlu1 %25  }
  0x7d   :  { %16 = vst.msk [vmem:[#allocation0] sm:$0x1] %vm15_vm2, %v14_v38   ;;  %v92_v40 = vpop.permute.xlu2 %91   ;;  %vm111_vm2 = vcmask 490944  }
  0x7e   :  { %22 = vst.msk [vmem:[#allocation0] sm:$0x1] %vm21_vm3, %v20_v36   ;;  %vm117_vm3 = vcmask 458144  }
  0x7f   :  { %28 = vst.msk [vmem:[#allocation0] sm:$0x1] %vm27_vm4, %v26_v39   ;;  %vm123_vm4 = vcmask 425344  }
  0x80   :  { %34 = vst.msk [vmem:[#allocation0] sm:$0x1] %vm33_vm5, %v32_v32   ;;  %vm129_vm5 = vcmask 392544  }
  0x81   :  { %40 = vst.msk [vmem:[#allocation0] sm:$0x1] %vm39_vm6, %v38_v33   ;;  %vm135_vm6 = vcmask 359744  }
  0x84   :  { %v44_v41 = vpop.permute.xlu0 %43   ;;  %v50_v42 = vpop.permute.xlu1 %49  }
  0x85   :  { %46 = vst.msk [vmem:[#allocation0] sm:$0x1] %vm45_vm7, %v44_v41   ;;  %v110_v43 = vpop.permute.xlu2 %109   ;;  %vm141_vm7 = vcmask 326944  }
  0x86   :  { %52 = vst.msk [vmem:[#allocation0] sm:$0x1] %vm51_vm8, %v50_v42   ;;  %vm147_vm8 = vcmask 294144  }
  0x87   :  { %58 = vst.msk [vmem:[#allocation0] sm:$0x1] %vm57_vm9, %v56_v34   ;;  %vm153_vm9 = vcmask 261344  }
  0x8c   :  { %v62_v44 = vpop.permute.xlu0 %61   ;;  %v68_v45 = vpop.permute.xlu1 %67  }
  0x8d   :  { %64 = vst.msk [vmem:[#allocation0] sm:$0x1] %vm63_vm10, %v62_v44   ;;  %v128_v46 = vpop.permute.xlu2 %127   ;;  %vm159_vm10 = vcmask 228544  }
  0x8e   :  { %70 = vst.msk [vmem:[#allocation0] sm:$0x1] %vm69_vm11, %v68_v45   ;;  %vm165_vm11 = vcmask 195744  }
  0x8f   :  { %76 = vst.msk [vmem:[#allocation0] sm:$0x1] %vm75_vm12, %v74_v37   ;;  %vm171_vm12 = vcmask 162944  }
  0x94   :  { %v80_v47 = vpop.permute.xlu0 %79   ;;  %v86_v48 = vpop.permute.xlu1 %85  }
  0x95   :  { %82 = vst.msk [vmem:[#allocation0] sm:$0x1] %vm81_vm13, %v80_v47   ;;  %v146_v49 = vpop.permute.xlu2 %145   ;;  %vm177_vm13 = vcmask 130144  }
  0x96   :  { %88 = vst.msk [vmem:[#allocation0] sm:$0x1] %vm87_vm14, %v86_v48   ;;  %vm183_vm14 = vcmask 97344  }
  0x97   :  { %94 = vst.msk [vmem:[#allocation0] sm:$0x1] %vm93_vm15, %v92_v40   ;;  %vm189_vm15 = vcmask 64544  }
  0x9c   :  { %v98_v50 = vpop.permute.xlu0 %97   ;;  %v104_v51 = vpop.permute.xlu1 %103  }
  0x9d   :  { %100 = vst.msk [vmem:[#allocation0] sm:$0x1] %vm99_vm0, %v98_v50   ;;  %v164_v52 = vpop.permute.xlu2 %163  }
  0x9e   :  { %106 = vst.msk [vmem:[#allocation0] sm:$0x1] %vm105_vm1, %v104_v51  }
  0x9f   :  { %112 = vst.msk [vmem:[#allocation0] sm:$0x1] %vm111_vm2, %v110_v43  }
  0xa4   :  { %v116_v53 = vpop.permute.xlu0 %115   ;;  %v122_v54 = vpop.permute.xlu1 %121  }
  0xa5   :  { %118 = vst.msk [vmem:[#allocation0] sm:$0x1] %vm117_vm3, %v116_v53   ;;  %v182_v55 = vpop.permute.xlu2 %181  }
  0xa6   :  { %124 = vst.msk [vmem:[#allocation0] sm:$0x1] %vm123_vm4, %v122_v54  }
  0xa7   :  { %130 = vst.msk [vmem:[#allocation0] sm:$0x1] %vm129_vm5, %v128_v46  }
  0xac   :  { %v134_v56 = vpop.permute.xlu0 %133   ;;  %v140_v57 = vpop.permute.xlu1 %139  }
  0xad   :  { %136 = vst.msk [vmem:[#allocation0] sm:$0x1] %vm135_vm6, %v134_v56  }
  0xae   :  { %142 = vst.msk [vmem:[#allocation0] sm:$0x1] %vm141_vm7, %v140_v57  }
  0xaf   :  { %148 = vst.msk [vmem:[#allocation0] sm:$0x1] %vm147_vm8, %v146_v49  }
  0xb4   :  { %v152_v58 = vpop.permute.xlu0 %151   ;;  %v158_v59 = vpop.permute.xlu1 %157  }
  0xb5   :  { %154 = vst.msk [vmem:[#allocation0] sm:$0x1] %vm153_vm9, %v152_v58  }
  0xb6   :  { %160 = vst.msk [vmem:[#allocation0] sm:$0x1] %vm159_vm10, %v158_v59  }
  0xb7   :  { %166 = vst.msk [vmem:[#allocation0] sm:$0x1] %vm165_vm11, %v164_v52  }
  0xbc   :  { %v170_v60 = vpop.permute.xlu0 %169   ;;  %v176_v61 = vpop.permute.xlu1 %175  }
  0xbd   :  { %172 = vst.msk [vmem:[#allocation0] sm:$0x1] %vm171_vm12, %v170_v60  }
  0xbe   :  { %178 = vst.msk [vmem:[#allocation0] sm:$0x1] %vm177_vm13, %v176_v61  }
  0xbf   :  { %184 = vst.msk [vmem:[#allocation0] sm:$0x1] %vm183_vm14, %v182_v55  }
  0xc4   :  { %v188_v62 = vpop.permute.xlu0 %187  }
  0xc5   :  { %190 = vst.msk [vmem:[#allocation0] sm:$0x1] %vm189_vm15, %v188_v62  }
  0xcc   :  { %v193_v63 = vld [vmem:[#allocation0] sm:$0x1] }
  0xcd   :  { %196 = vst [vmem:[%s400_s1] sm:$0x1] %v193_v63 }

// kernel: residual_block.1
= control target key start
LH: loop header
LB: loop body
LE: loop exit
PB: predicated region body
PF: predicated region fallthrough
CT: control target
= control target key end

     0   :  { %vm35_vm0 = vcmask 1046528   ;;  %vm43_vm1 = vcmask 1045504   ;;  %vm306_vm2 = vcmask 1040384   ;;  %vm977_vm7 = vmmov 1   ;;  %s1276_s1 = inlined_call_operand.vmem [shape: bf16[384,128], index: 1, kind: input, shape index: {}]   ;;  %s1277_s0 = inlined_call_operand.vmem [shape: f32[1,18,128], index: 0, kind: input, shape index: {}]   ;;  %s1278_s7 = inlined_call_operand.vmem [shape: f32[128,128], index: 7, kind: input, shape index: {}]   ;;  %s1279_s4 = inlined_call_operand.vmem [shape: bf16[384,128], index: 4, kind: input, shape index: {}]   ;;  %s1280_s2 = inlined_call_operand.vmem [shape: f32[1,128], index: 2, kind: input, shape index: {}]   ;;  %s1281_s3 = inlined_call_operand.vmem [shape: f32[1,128], index: 3, kind: input, shape index: {}]   ;;  %s1282_s5 = inlined_call_operand.vmem [shape: f32[1,128], index: 5, kind: input, shape index: {}]   ;;  %s1283_s6 = inlined_call_operand.vmem [shape: f32[1,128], index: 6, kind: input, shape index: {}]   ;;  %s1284_s8 = inlined_call_operand.vmem [shape: f32[1,16,128], index: 8, kind: output, shape index: {}]  }
   0x1   :  { %v931_v0 = vld [vmem:[%s1276_s1 + $0x38] sm:$0xff]  ;;  %v930_v3 = vld [vmem:[%s1276_s1 + $0x30] sm:$0xff]  ;;  %v929_v6 = vld [vmem:[%s1276_s1 + $0x28] sm:$0xff] }
   0x2   :  { %v939_v1 = vld [vmem:[%s1276_s1 + $0x78] sm:$0xff]  ;;  %246 = vmatpush.bf16.msra.mxu0 %v931_v0  ;;  %v938_v4 = vld [vmem:[%s1276_s1 + $0x70] sm:$0xff]  ;;  %v937_v7 = vld [vmem:[%s1276_s1 + $0x68] sm:$0xff] }
   0x3   :  { %v947_v2 = vld [vmem:[%s1276_s1 + $0xb8] sm:$0xff]  ;;  %260 = vmatpush.bf16.msra.mxu1 %v939_v1  ;;  %v946_v5 = vld [vmem:[%s1276_s1 + $0xb0] sm:$0xff]  ;;  %v945_v8 = vld [vmem:[%s1276_s1 + $0xa8] sm:$0xff] }
   0x4   :  { %274 = vmatpush.bf16.msra.mxu2 %v947_v2  ;;  %v928_v9 = vld [vmem:[%s1276_s1 + $0x20] sm:$0xff]  ;;  %v927_v12 = vld [vmem:[%s1276_s1 + $0x18] sm:$0xff]  ;;  %v926_v15 = vld [vmem:[%s1276_s1 + $0x10] sm:$0xff] }
   0x5   :  { %v936_v10 = vld [vmem:[%s1276_s1 + $0x60] sm:$0xff]  ;;  %v935_v13 = vld [vmem:[%s1276_s1 + $0x58] sm:$0xff]  ;;  %v934_v16 = vld [vmem:[%s1276_s1 + $0x50] sm:$0xff] }
   0x6   :  { %247 = vmatpush.bf16.msra.mxu0 %v930_v3  ;;  %v944_v11 = vld [vmem:[%s1276_s1 + $0xa0] sm:$0xff]  ;;  %v943_v14 = vld [vmem:[%s1276_s1 + $0x98] sm:$0xff]  ;;  %v942_v17 = vld [vmem:[%s1276_s1 + $0x90] sm:$0xff] }
   0x7   :  { %261 = vmatpush.bf16.msra.mxu1 %v938_v4  ;;  %v29_v18 = vld [vmem:[%s1277_s0] sm:$0xff]  ;;  %v30_v19 = vld [vmem:[%s1277_s0 + $0x8] sm:$0xff]  ;;  %v31_v20 = vld [vmem:[%s1277_s0 + $0x10] sm:$0x3] }
   0x8   :  { %275 = vmatpush.bf16.msra.mxu2 %v946_v5  ;;  %v925_v21 = vld [vmem:[%s1276_s1 + $0x8] sm:$0xff]  ;;  %v36_v23 = vrot.slane %v29_v18, 1  ;;  %v37_v24 = vrot.slane %v30_v19, 1  ;;  %v39_v25 = vrot.slane %v31_v20, 1  ;;  %v44_v27 = vrot.slane %v29_v18, 2  ;;  %v924_v30 = vld [vmem:[%s1276_s1] sm:$0xff]  ;;  %vm920_vm6 = vmneg %vm306_vm2 }
   0x9   :  { %v933_v22 = vld [vmem:[%s1276_s1 + $0x48] sm:$0xff]  ;;  %v45_v28 = vrot.slane %v30_v19, 2  ;;  %v47_v29 = vrot.slane %v31_v20, 2  ;;  %v932_v31 = vld [vmem:[%s1276_s1 + $0x40] sm:$0xff]  ;;  %v51_v37 = vpack.c.bf16 %v30_v19, %v29_v18  ;;  %v323_v40 = vld [vmem:[%s1278_s7 + $0x78] sm:$0xff] }
   0xa   :  { %248 = vmatpush.bf16.msra.mxu0 %v929_v6  ;;  %v941_v26 = vld [vmem:[%s1276_s1 + $0x88] sm:$0xff]  ;;  %v1102_v32 = vsel %vm35_vm0, %v36_v23, %v37_v24  ;;  %v1105_v33 = vsel %vm35_vm0, %v37_v24, %v39_v25  ;;  %v940_v34 = vld [vmem:[%s1276_s1 + $0x80] sm:$0xff]  ;;  %v322_v41 = vld [vmem:[%s1278_s7 + $0x70] sm:$0xff]  ;;  %324 = vmatpush.msra.mxu3 %v323_v40 }
   0xb   :  { %262 = vmatpush.bf16.msra.mxu1 %v937_v7  ;;  %v46_v35 = vsel %vm43_vm1, %v44_v27, %v45_v28  ;;  %v48_v36 = vsel %vm43_vm1, %v45_v28, %v47_v29  ;;  %v52_v38 = vpack.c.bf16 %v1105_v33, %v1102_v32  ;;  %v321_v42 = vld [vmem:[%s1278_s7 + $0x68] sm:$0xff]  ;;  %v320_v43 = vld [vmem:[%s1278_s7 + $0x60] sm:$0xff]  ;;  %v319_v44 = vld [vmem:[%s1278_s7 + $0x58] sm:$0xff] }
   0xc   :  { %276 = vmatpush.bf16.msra.mxu2 %v945_v8  ;;  %v53_v39 = vpack.c.bf16 %v48_v36, %v46_v35  ;;  %325 = vmatpush.msra.mxu3 %v322_v41  ;;  %v318_v45 = vld [vmem:[%s1278_s7 + $0x50] sm:$0xff]  ;;  %v317_v46 = vld [vmem:[%s1278_s7 + $0x48] sm:$0xff]  ;;  %v316_v47 = vld [vmem:[%s1278_s7 + $0x40] sm:$0xff] }
   0xd   :  { %v315_v48 = vld [vmem:[%s1278_s7 + $0x38] sm:$0xff]  ;;  %v314_v49 = vld [vmem:[%s1278_s7 + $0x30] sm:$0xff]  ;;  %v313_v50 = vld [vmem:[%s1278_s7 + $0x28] sm:$0xff] }
   0xe   :  { %249 = vmatpush.bf16.msra.mxu0 %v928_v9  ;;  %326 = vmatpush.msra.mxu3 %v321_v42  ;;  %v312_v51 = vld [vmem:[%s1278_s7 + $0x20] sm:$0xff]  ;;  %v311_v52 = vld [vmem:[%s1278_s7 + $0x18] sm:$0xff]  ;;  %v310_v53 = vld [vmem:[%s1278_s7 + $0x10] sm:$0xff] }
   0xf   :  { %263 = vmatpush.bf16.msra.mxu1 %v936_v10  ;;  %v309_v54 = vld [vmem:[%s1278_s7 + $0x8] sm:$0xff]  ;;  %v308_v55 = vld [vmem:[%s1278_s7] sm:$0xff]  ;;  %v955_v19 = vld [vmem:[%s1279_s4 + $0x38] sm:$0xff] }
  0x10   :  { %277 = vmatpush.bf16.msra.mxu2 %v944_v11  ;;  %327 = vmatpush.msra.mxu3 %v320_v43  ;;  %v963_v20 = vld [vmem:[%s1279_s4 + $0x78] sm:$0xff]  ;;  %v962_v23 = vld [vmem:[%s1279_s4 + $0x70] sm:$0xff]  ;;  %v953_v25 = vld [vmem:[%s1279_s4 + $0x28] sm:$0xff] }
  0x11   :  { %v970_v24 = vld [vmem:[%s1279_s4 + $0xb0] sm:$0xff]  ;;  %v961_v27 = vld [vmem:[%s1279_s4 + $0x68] sm:$0xff]  ;;  %v968_v35 = vld [vmem:[%s1279_s4 + $0xa0] sm:$0xff] }
  0x12   :  { %250 = vmatpush.bf16.msra.mxu0 %v927_v12  ;;  %328 = vmatpush.msra.mxu3 %v319_v44  ;;  %v969_v28 = vld [vmem:[%s1279_s4 + $0xa8] sm:$0xff]  ;;  %vm921_vm8 = vmpackc.low %vm977_vm7, %vm920_vm6 }
  0x13   :  { %264 = vmatpush.bf16.msra.mxu1 %v935_v13 }
  0x14   :  { %278 = vmatpush.bf16.msra.mxu2 %v943_v14  ;;  %329 = vmatpush.msra.mxu3 %v318_v45 }
  0x16   :  { %251 = vmatpush.bf16.msra.mxu0 %v926_v15  ;;  %330 = vmatpush.msra.mxu3 %v317_v46 }
  0x17   :  { %265 = vmatpush.bf16.msra.mxu1 %v934_v16 }
  0x18   :  { %279 = vmatpush.bf16.msra.mxu2 %v942_v17  ;;  %331 = vmatpush.msra.mxu3 %v316_v47 }
  0x1a   :  { %252 = vmatpush.bf16.msra.mxu0 %v925_v21  ;;  %332 = vmatpush.msra.mxu3 %v315_v48  ;;  %v971_v21 = vld [vmem:[%s1279_s4 + $0xb8] sm:$0xff] }
  0x1b   :  { %266 = vmatpush.bf16.msra.mxu1 %v933_v22  ;;  %v954_v22 = vld [vmem:[%s1279_s4 + $0x30] sm:$0xff] }
  0x1c   :  { %280 = vmatpush.bf16.msra.mxu2 %v941_v26  ;;  %333 = vmatpush.msra.mxu3 %v314_v49 }
  0x1e   :  { %253 = vmatpush.bf16.msra.mxu0 %v924_v30  ;;  %334 = vmatpush.msra.mxu3 %v313_v50  ;;  %v952_v30 = vld [vmem:[%s1279_s4 + $0x20] sm:$0xff] }
  0x1f   :  { %267 = vmatpush.bf16.msra.mxu1 %v932_v31 }
  0x20   :  { %281 = vmatpush.bf16.msra.mxu2 %v940_v34  ;;  %335 = vmatpush.msra.mxu3 %v312_v51  ;;  %v960_v34 = vld [vmem:[%s1279_s4 + $0x60] sm:$0xff] }
  0x21   :  { %254 = vmatmul.bf16.vlgmr.msra.gmra.mxu0 %v51_v37  ;;  %v951_v37 = vld [vmem:[%s1279_s4 + $0x18] sm:$0xff] }
  0x22   :  { %268 = vmatmul.bf16.vlgmr.msra.gmra.mxu1 %v52_v38  ;;  %336 = vmatpush.msra.mxu3 %v311_v52 }
  0x23   :  { %282 = vmatmul.bf16.vlgmr.msra.gmra.mxu2 %v53_v39  ;;  %602 = vmatpush.bf16.msrb.mxu0 %v955_v19  ;;  %v959_v39 = vld [vmem:[%s1279_s4 + $0x58] sm:$0xff] }
  0x24   :  { %337 = vmatpush.msra.mxu3 %v310_v53  ;;  %616 = vmatpush.bf16.msrb.mxu1 %v963_v20 }
  0x25   :  { %630 = vmatpush.bf16.msrb.mxu2 %v971_v21 }
  0x26   :  { %338 = vmatpush.msra.mxu3 %v309_v54 }
  0x27   :  { %603 = vmatpush.bf16.msrb.mxu0 %v954_v22 }
  0x28   :  { %339 = vmatpush.msra.mxu3 %v308_v55  ;;  %617 = vmatpush.bf16.msrb.mxu1 %v962_v23 }
  0x29   :  { %631 = vmatpush.bf16.msrb.mxu2 %v970_v24 }
  0x2a   :  { %663 = vmatpush.msrb.mxu3 %v323_v40  ;;  %v967_v40 = vld [vmem:[%s1279_s4 + $0x98] sm:$0xff] }
  0x2b   :  { %604 = vmatpush.bf16.msrb.mxu0 %v953_v25 }
  0x2c   :  { %664 = vmatpush.msrb.mxu3 %v322_v41  ;;  %618 = vmatpush.bf16.msrb.mxu1 %v961_v27 }
  0x2d   :  { %632 = vmatpush.bf16.msrb.mxu2 %v969_v28 }
  0x2e   :  { %665 = vmatpush.msrb.mxu3 %v321_v42  ;;  %v950_v42 = vld [vmem:[%s1279_s4 + $0x10] sm:$0xff] }
  0x2f   :  { %605 = vmatpush.bf16.msrb.mxu0 %v952_v30 }
  0x30   :  { %666 = vmatpush.msrb.mxu3 %v320_v43  ;;  %619 = vmatpush.bf16.msrb.mxu1 %v960_v34  ;;  %v958_v43 = vld [vmem:[%s1279_s4 + $0x50] sm:$0xff] }
  0x31   :  { %633 = vmatpush.bf16.msrb.mxu2 %v968_v35 }
  0x32   :  { %667 = vmatpush.msrb.mxu3 %v319_v44  ;;  %v966_v44 = vld [vmem:[%s1279_s4 + $0x90] sm:$0xff] }
  0x33   :  { %606 = vmatpush.bf16.msrb.mxu0 %v951_v37 }
  0x34   :  { %668 = vmatpush.msrb.mxu3 %v318_v45  ;;  %620 = vmatpush.bf16.msrb.mxu1 %v959_v39  ;;  %v949_v45 = vld [vmem:[%s1279_s4 + $0x8] sm:$0xff] }
  0x35   :  { %634 = vmatpush.bf16.msrb.mxu2 %v967_v40 }
  0x36   :  { %669 = vmatpush.msrb.mxu3 %v317_v46  ;;  %v957_v46 = vld [vmem:[%s1279_s4 + $0x48] sm:$0xff] }
  0x37   :  { %607 = vmatpush.bf16.msrb.mxu0 %v950_v42 }
  0x38   :  { %670 = vmatpush.msrb.mxu3 %v316_v47  ;;  %621 = vmatpush.bf16.msrb.mxu1 %v958_v43  ;;  %v965_v47 = vld [vmem:[%s1279_s4 + $0x88] sm:$0xff] }
  0x39   :  { %635 = vmatpush.bf16.msrb.mxu2 %v966_v44 }
  0x3a   :  { %671 = vmatpush.msrb.mxu3 %v315_v48 }
  0x3b   :  { %608 = vmatpush.bf16.msrb.mxu0 %v949_v45 }
  0x3c   :  { %672 = vmatpush.msrb.mxu3 %v314_v49  ;;  %v948_v49 = vld [vmem:[%s1279_s4] sm:$0xff]  ;;  %622 = vmatpush.bf16.msrb.mxu1 %v957_v46 }
  0x3d   :  { %636 = vmatpush.bf16.msrb.mxu2 %v965_v47 }
  0x3e   :  { %673 = vmatpush.msrb.mxu3 %v313_v50 }
  0x3f   :  { %609 = vmatpush.bf16.msrb.mxu0 %v948_v49 }
  0x40   :  { %674 = vmatpush.msrb.mxu3 %v312_v51 }
  0x42   :  { %675 = vmatpush.msrb.mxu3 %v311_v52  ;;  %v956_v52 = vld [vmem:[%s1279_s4 + $0x40] sm:$0xff] }
  0x43   :  { %623 = vmatpush.bf16.msrb.mxu1 %v956_v52 }
  0x44   :  { %676 = vmatpush.msrb.mxu3 %v310_v53  ;;  %v964_v53 = vld [vmem:[%s1279_s4 + $0x80] sm:$0xff] }
  0x45   :  { %637 = vmatpush.bf16.msrb.mxu2 %v964_v53 }
  0x46   :  { %677 = vmatpush.msrb.mxu3 %v309_v54 }
  0x48   :  { %678 = vmatpush.msrb.mxu3 %v308_v55 }
  0x9e   :  { %v255_v56 = vpop.f32.mrf.mxu0 }
  0x9f   :  { %v269_v57 = vpop.f32.mrf.mxu1 }
  0xa0   :  { %v270_v59 = vadd.f32 %v269_v57, %v255_v56 }
  0xa6   :  { %v283_v58 = vpop.f32.mrf.mxu2  ;;  %v257_v60 = vpop.f32.mrf.mxu0 }
  0xa7   :  { %v271_v61 = vpop.f32.mrf.mxu1  ;;  %v1162_v62 = vadd.f32 %v283_v58, %v270_v59  ;;  %v288_v58 = vld [vmem:[%s1280_s2] sm:$0x1] }
  0xa8   :  { %v272_v63 = vadd.f32 %v271_v61, %v257_v60  ;;  %v289_v61 = vld [vmem:[%s1281_s3] sm:$0x1] }
  0xa9   :  { %v297_v2 = vmul.f32 %v1162_v62, %v1162_v62 }
  0xae   :  { %v285_v0 = vpop.f32.mrf.mxu2 }
  0xaf   :  { %v1164_v1 = vadd.f32 %v285_v0, %v272_v63 }
  0xb1   :  { %v290_v3 = vadd.f32 %v1164_v1, %v1162_v62  ;;  %v298_v4 = vmul.f32 %v1164_v1, %v1164_v1 }
  0xb3   :  { %v291_v5 = vrot.slane %v290_v3, 4  ;;  %v299_v6 = vadd.f32 %v298_v4, %v297_v2 }
  0xb5   :  { %v292_v7 = vadd.f32 %v291_v5, %v290_v3  ;;  %v300_v8 = vrot.slane %v299_v6, 4 }
  0xb7   :  { %v293_v9 = vrot.slane %v292_v7, 2  ;;  %v301_v10 = vadd.f32 %v300_v8, %v299_v6 }
  0xb9   :  { %v294_v11 = vadd.f32 %v293_v9, %v292_v7  ;;  %v302_v12 = vrot.slane %v301_v10, 2 }
  0xbb   :  { %v295_v13 = vrot.slane %v294_v11, 1  ;;  %v303_v14 = vadd.f32 %v302_v12, %v301_v10 }
  0xbd   :  { %v304_v15 = vrot.slane %v303_v14, 1  ;;  %v296_v16 = vadd.f32 %v295_v13, %v294_v11 }
  0xbf   :  { %v305_v17 = vadd.f32 %v304_v15, %v303_v14 }
  0xc1   :  { %v307_v18 = vsel %vm306_vm2, %v296_v16, %v305_v17 }
  0xc2   :  { %340 = vmatmul.f32.vlgmr.msra.gmra.mxu3 %v307_v18 }
 0x145   :  { %v341_v26 = vpop.f32.mrf.mxu3 }
 0x146   :  { %v344_v29 = vmul.f32 %v341_v26, %v341_v26 }
 0x148   :  { %v346_v31 = vrot.slane %v344_v29, 7 }
 0x14a   :  { %v348_v36 = vsub.f32 %v341_v26, %v346_v31 }
 0x14c   :  { %v349_v38 = vmax.f32 %v348_v36, 0.0 }
 0x14e   :  { %v350_v41 = vadd.f32 1e-05, %v349_v38 }
 0x150   :  { %973 = vrsqrt.f32 %v350_v41  ;;  %vm357_vm4 = vweird.f32 %v350_v41 }
 0x156   :  { %v974_v48 = vpop.eup %973 }
 0x157   :  { %v352_v50 = vmul.f32 %v974_v48, %v350_v41  ;;  %vm358_vm3 = vweird.f32 %v974_v48 }
 0x158   :  { %vm359_vm5 = vmor %vm357_vm4, %vm358_vm3 }
 0x159   :  { %v353_v51 = vmul.f32 %v974_v48, %v352_v50 }
 0x15b   :  { %v354_v54 = vmul.f32 0.5, %v353_v51 }
 0x15d   :  { %v355_v55 = vsub.f32 1.5, %v354_v54 }
 0x15f   :  { %v356_v56 = vmul.f32 %v974_v48, %v355_v55 }
 0x161   :  { %v360_v57 = vsel %vm359_vm5, %v974_v48, %v356_v56 }
 0x162   :  { %362 = vst [vmem:[#allocation1] sm:$0xff] %v360_v57 }
 0x169   :  { %v364_v59 = vld [vmem:[#allocation1 + $0x1] ss:$9 sm:$0xff] }
 0x16a   :  { %v366_v60 = vmul.f32 %v364_v59, %v288_v58 }
 0x16c   :  { %v367_v63 = vmul.f32 %v366_v60, %v341_v26  ;;  %v370_v0 = vperm.slane %v366_v60, 0 }
 0x16e   :  { %v368_v2 = vsub.f32 %v289_v61, %v367_v63  ;;  %v372_v3 = vmul.f32 %v370_v0, %v1162_v62  ;;  %v373_v4 = vmul.f32 %v370_v0, %v1164_v1 }
 0x170   :  { %v375_v5 = vperm.slane %v368_v2, 0 }
 0x172   :  { %v377_v6 = vadd.f32 %v375_v5, %v372_v3  ;;  %v378_v7 = vadd.f32 %v375_v5, %v373_v4 }
 0x174   :  { %v379_v8 = vmax.f32 %v377_v6, 0.0  ;;  %v380_v9 = vmax.f32 %v378_v7, 0.0  ;;  %v644_v6 = vld [vmem:[%s1282_s5] sm:$0x1] }
 0x176   :  { %v383_v10 = vrot.slane %v379_v8, 7  ;;  %v384_v11 = vrot.slane %v380_v9, 7  ;;  %v645_v9 = vld [vmem:[%s1283_s6] sm:$0x1] }
 0x178   :  { %v385_v12 = vsel %vm306_vm2, %v383_v10, %v384_v11  ;;  %v389_v13 = vsel %vm306_vm2, 0.0, %v383_v10  ;;  %v390_v14 = vsel %vm306_vm2, %v384_v11, 0.0 }
 0x179   :  { %v922_v62 = vpack.c.bf16 %v385_v12, %v383_v10  ;;  %v393_v15 = vrot.slane %v389_v13, 1  ;;  %v394_v1 = vrot.slane %v385_v12, 1  ;;  %v396_v16 = vrot.slane %v390_v14, 1 }
 0x17a   :  { %v400_v17 = vrot.slane %v389_v13, 2  ;;  %v401_v18 = vrot.slane %v385_v12, 2  ;;  %v403_v19 = vrot.slane %v390_v14, 2 }
 0x17b   :  { %923 = vmatmul.msk.bf16.vlgmr.msrb.gmra.mxu0 %vm921_vm8, %v922_v62  ;;  %v395_v20 = vsel %vm35_vm0, %v393_v15, %v394_v1  ;;  %v397_v21 = vsel %vm35_vm0, %v394_v1, %v396_v16 }
 0x17c   :  { %v408_v22 = vpack.c.bf16 %v397_v21, %v395_v20  ;;  %v402_v23 = vsel %vm43_vm1, %v400_v17, %v401_v18  ;;  %v404_v24 = vsel %vm43_vm1, %v401_v18, %v403_v19 }
 0x17d   :  { %v409_v25 = vpack.c.bf16 %v404_v24, %v402_v23 }
 0x17e   :  { %624 = vmatmul.bf16.vlgmr.msrb.gmra.mxu1 %v408_v22 }
 0x17f   :  { %638 = vmatmul.bf16.vlgmr.msrb.gmra.mxu2 %v409_v25 }
 0x1f8   :  { %v611_v27 = vpop.f32.mrf.mxu0 }
 0x1fb   :  { %v625_v26 = vpop.f32.mrf.mxu1 }
 0x1fc   :  { %v626_v30 = vadd.f32 %v625_v26, %v611_v27 }
 0x200   :  { %v613_v31 = vpop.f32.mrf.mxu0 }
 0x202   :  { %v639_v28 = vpop.f32.mrf.mxu2 }
 0x203   :  { %v627_v29 = vpop.f32.mrf.mxu1  ;;  %v640_v34 = vadd.f32 %v639_v28, %v626_v30 }
 0x204   :  { %v628_v35 = vadd.f32 %v627_v29, %v613_v31 }
 0x205   :  { %v653_v38 = vmul.f32 %v640_v34, %v640_v34 }
 0x20a   :  { %v641_v36 = vpop.f32.mrf.mxu2 }
 0x20b   :  { %v642_v37 = vadd.f32 %v641_v36, %v628_v35 }
 0x20d   :  { %v646_v39 = vadd.f32 %v642_v37, %v640_v34  ;;  %v654_v40 = vmul.f32 %v642_v37, %v642_v37 }
 0x20f   :  { %v647_v41 = vrot.slane %v646_v39, 4  ;;  %v655_v42 = vadd.f32 %v654_v40, %v653_v38 }
 0x211   :  { %v648_v43 = vadd.f32 %v647_v41, %v646_v39  ;;  %v656_v44 = vrot.slane %v655_v42, 4 }
 0x213   :  { %v649_v45 = vrot.slane %v648_v43, 2  ;;  %v657_v46 = vadd.f32 %v656_v44, %v655_v42 }
 0x215   :  { %v650_v47 = vadd.f32 %v649_v45, %v648_v43  ;;  %v658_v48 = vrot.slane %v657_v46, 2 }
 0x217   :  { %v651_v49 = vrot.slane %v650_v47, 1  ;;  %v659_v50 = vadd.f32 %v658_v48, %v657_v46 }
 0x219   :  { %v660_v51 = vrot.slane %v659_v50, 1  ;;  %v652_v52 = vadd.f32 %v651_v49, %v650_v47 }
 0x21b   :  { %v661_v53 = vadd.f32 %v660_v51, %v659_v50 }
 0x21d   :  { %v662_v54 = vsel %vm306_vm2, %v652_v52, %v661_v53 }
 0x21e   :  { %679 = vmatmul.f32.vlgmr.msrb.gmra.mxu3 %v662_v54 }
 0x2a1   :  { %v680_v55 = vpop.f32.mrf.mxu3 }
 0x2a2   :  { %v683_v56 = vmul.f32 %v680_v55, %v680_v55 }
 0x2a4   :  { %v685_v57 = vrot.slane %v683_v56, 7 }
 0x2a6   :  { %v687_v58 = vsub.f32 %v680_v55, %v685_v57 }
 0x2a8   :  { %v688_v59 = vmax.f32 %v687_v58, 0.0 }
 0x2aa   :  { %v689_v60 = vadd.f32 1e-05, %v688_v59 }
 0x2ac   :  { %975 = vrsqrt.f32 %v689_v60  ;;  %vm696_vm10 = vweird.f32 %v689_v60 }
 0x2b2   :  { %v976_v61 = vpop.eup %975 }
 0x2b3   :  { %v691_v63 = vmul.f32 %v976_v61, %v689_v60  ;;  %vm697_vm9 = vweird.f32 %v976_v61 }
 0x2b4   :  { %vm698_vm11 = vmor %vm696_vm10, %vm697_vm9 }
 0x2b5   :  { %v692_v0 = vmul.f32 %v976_v61, %v691_v63 }
 0x2b7   :  { %v693_v2 = vmul.f32 0.5, %v692_v0 }
 0x2b9   :  { %v694_v3 = vsub.f32 1.5, %v693_v2 }
 0x2bb   :  { %v695_v4 = vmul.f32 %v976_v61, %v694_v3 }
 0x2bd   :  { %v699_v5 = vsel %vm698_vm11, %v976_v61, %v695_v4 }
 0x2be   :  { %701 = vst [vmem:[#allocation1] sm:$0xff] %v699_v5 }
 0x2c5   :  { %v703_v7 = vld [vmem:[#allocation1 + $0x1] ss:$9 sm:$0xff] }
 0x2c6   :  { %v705_v8 = vmul.f32 %v703_v7, %v644_v6 }
 0x2c8   :  { %v706_v10 = vmul.f32 %v705_v8, %v680_v55  ;;  %v709_v11 = vperm.slane %v705_v8, 0 }
 0x2ca   :  { %v707_v12 = vsub.f32 %v645_v9, %v706_v10  ;;  %v711_v13 = vmul.f32 %v709_v11, %v640_v34  ;;  %v712_v14 = vmul.f32 %v709_v11, %v642_v37 }
 0x2cc   :  { %v714_v62 = vperm.slane %v707_v12, 0 }
 0x2ce   :  { %v716_v15 = vadd.f32 %v714_v62, %v711_v13  ;;  %v717_v1 = vadd.f32 %v714_v62, %v712_v14 }
 0x2d0   :  { %v718_v16 = vadd.f32 %v716_v15, %v1102_v32  ;;  %v719_v17 = vadd.f32 %v717_v1, %v1105_v33 }
 0x2d2   :  { %v720_v18 = vmax.f32 %v718_v16, 0.0  ;;  %v721_v19 = vmax.f32 %v719_v17, 0.0 }
 0x2d4   :  { %722 = vst [vmem:[%s1284_s8] sm:$0xff] %v720_v18 }
 0x2d5   :  { %723 = vst [vmem:[%s1284_s8 + $0x8] sm:$0xff] %v721_v19 }

</bundles_post_ra>
